<compile_context>
chip_gen: v6e
topology: v6e:2x2x1
jax: 0.10.0
libtpu: 0.0.40
codegen_flags: <defaults>
</compile_context>

<pallas_src>
import functools
from typing import NamedTuple

import jax
import jax.numpy as jnp
from jax.experimental import pallas as pl
from jax.experimental.pallas import tpu as pltpu


def _round_up(x, m):
    return (x + m - 1) // m * m


def _halve_mult8(t):
    return max(8, (t // 16) * 8)


def _vmem_limit_bytes():
    """Per-generation scoped-VMEM limit (leave headroom on v7x's 64 MiB)."""
    try:
        cap = pltpu.get_tpu_info().vmem_capacity_bytes
    except Exception:  # host-side query only; interpret mode / no TPU info
        cap = 64 * 1024 * 1024
    return min(int(0.75 * cap), 96 * 1024 * 1024)


class GloceParams(NamedTuple):
    w: jax.Array          # (Din_p, Dp)            compute_dtype, padded Linear W
    b: jax.Array          # (1, Dp)                f32, padded Linear bias
    fused_rhs: jax.Array  # (Dp, N + N*S + N*R + N) compute_dtype
    fused_off: jax.Array  # (1, N + N*S + N*R + N)  f32
    msq: jax.Array        # (1, N)                 f32, ||mean_n||^2
    seg: jax.Array        # (N*S, N)               f32, per-concept segment sum
    dgb: jax.Array        # (N*R + N, Dp)          compute_dtype, [lora_degen^T ; bias]
    ids: jax.Array        # (1, N*R + N)           int32 concept id per column
    center: jax.Array     # (1, N)                 f32
    slope: jax.Array      # (1, N)                 f32


class GloceDims(NamedTuple):
    d_in: int
    d_out: int
    d_in_p: int
    d_out_p: int
    n: int
    s: int
    r: int


def prepare_gloce_params(W, b_lin, mean_diff, vh, center, slope,
                         lora_up, lora_dg, bias_w, debias_w,
                         *, compute_dtype=jnp.bfloat16):
    """One-time host-side packing of the GLoCE parameters into the fused,
    lane-dense layouts the kernel consumes.  Call once at module init and
    reuse the result for every forward (not per call)."""
    f32 = jnp.float32
    Din, D = W.shape
    N, _, S = vh.shape
    R = lora_up.shape[-1]
    Dp, Din_p = _round_up(D, 128), _round_up(Din, 128)
    pad_d, pad_k = Dp - D, Din_p - Din

    W_p = jnp.pad(W.astype(f32), ((0, pad_k), (0, pad_d))).astype(compute_dtype)
    b_p = jnp.pad(b_lin.astype(f32), (0, pad_d)).reshape(1, Dp)
    mean_p = jnp.pad(mean_diff.astype(f32), ((0, 0), (0, pad_d)))        # (N, Dp)
    vh_p = jnp.pad(vh.astype(f32), ((0, 0), (0, pad_d), (0, 0)))         # (N, Dp, S)
    up_p = jnp.pad(lora_up.astype(f32), ((0, 0), (0, pad_d), (0, 0)))    # (N, Dp, R)
    dg_p = jnp.pad(lora_dg.astype(f32), ((0, 0), (0, pad_d), (0, 0)))    # (N, Dp, R)
    bias_p = jnp.pad(bias_w.astype(f32), ((0, 0), (0, pad_d)))           # (N, Dp)
    deb_p = jnp.pad(debias_w.astype(f32), ((0, 0), (0, pad_d)))          # (N, Dp)

    # Fused RHS: one (Dp, N + N*S + N*R + N) matrix so the kernel does a single
    # x @ rhs producing {x.mean_n, proj, mod, constant-one bias columns}.
    meanT = mean_p.T                                                     # (Dp, N)
    vh_all = jnp.transpose(vh_p, (1, 0, 2)).reshape(Dp, N * S)           # (Dp, N*S)
    up_all = jnp.transpose(up_p, (1, 0, 2)).reshape(Dp, N * R)           # (Dp, N*R)
    ones_cols = jnp.zeros((Dp, N), f32)          # x @ 0 - (-1) == 1 (bias columns)
    fused_rhs = jnp.concatenate([meanT, vh_all, up_all, ones_cols],
                                axis=1).astype(compute_dtype)

    off_mean = jnp.zeros((N,), f32)
    off_vh = jnp.einsum('nd,nds->ns', mean_p, vh_p).reshape(N * S)
    off_up = jnp.einsum('nd,ndr->nr', deb_p, up_p).reshape(N * R)
    off_ones = -jnp.ones((N,), f32)
    fused_off = jnp.concatenate([off_mean, off_vh, off_up, off_ones]).reshape(1, -1)

    msq = jnp.sum(mean_p * mean_p, axis=-1).reshape(1, N)
    seg = (jnp.repeat(jnp.arange(N), S)[:, None]
           == jnp.arange(N)[None, :]).astype(f32)                        # (N*S, N)
    dgb = jnp.concatenate(
        [jnp.transpose(dg_p, (0, 2, 1)).reshape(N * R, Dp), bias_p],
        axis=0).astype(compute_dtype)                                    # (N*R+N, Dp)
    ids = jnp.concatenate(
        [jnp.repeat(jnp.arange(N, dtype=jnp.int32), R),
         jnp.arange(N, dtype=jnp.int32)]).reshape(1, N * R + N)

    params = GloceParams(W_p, b_p, fused_rhs, fused_off, msq, seg, dgb, ids,
                         center.astype(f32).reshape(1, N),
                         slope.astype(f32).reshape(1, N))
    dims = GloceDims(Din, D, Din_p, Dp, N, S, R)
    return params, dims


def _gloce_kernel(x_ref, w_ref, b_ref, rhs_ref, off_ref, msq_ref, seg_ref,
                  dgb_ref, ids_ref, center_ref, slope_ref, out_ref,
                  *, n, s, eta, use_gate, compute_dtype):
    # ---- wrapped Linear: full contraction in one MXU pass (W is VMEM-resident)
    x = jnp.dot(x_ref[...].astype(compute_dtype), w_ref[...],
                preferred_element_type=jnp.float32) + b_ref[...]       # (Tt, Dp) f32
    tt = x.shape[0]

    # ---- one fused matmul for everything that contracts against x ----
    # columns: [ x.mean_n (N) | proj (N*S) | mod (N*R) | ones (N) ]
    fused = jnp.dot(x.astype(compute_dtype), rhs_ref[...],
                    preferred_element_type=jnp.float32) - off_ref[...]
    xm = fused[:, :n]                               # (Tt, N)        x . mean_n
    proj = fused[:, n:n + n * s]                    # (Tt, N*S)      (x - mean_n) . vh
    mod = fused[:, n + n * s:]                      # (Tt, N*R + N)  last N cols == 1

    # ---- concept selector ----
    # ||x - mean_n||^2 = ||x||^2 - 2 x.mean_n + ||mean_n||^2
    # (clamped to avoid the reference's 0/0 when x == mean_n exactly)
    xsq = jnp.sum(x * x, axis=-1, keepdims=True)                        # (Tt, 1)
    normsq = jnp.maximum(xsq - 2.0 * xm + msq_ref[...], 1e-12)          # (Tt, N)
    cont = jnp.dot(proj * proj, seg_ref[...],
                   preferred_element_type=jnp.float32)                  # (Tt, N)
    # exact divide: the score feeds an argmax, an approx reciprocal flips near-ties
    score = jax.nn.sigmoid(slope_ref[...] * (cont / normsq - center_ref[...]))

    best = jnp.max(score, axis=-1, keepdims=True)                       # (Tt, 1)
    iota_n = jax.lax.broadcasted_iota(jnp.int32, (tt, n), 1)
    first = jnp.min(jnp.where(score >= best, iota_n, n),
                    axis=-1, keepdims=True)                             # (Tt, 1) int32

    # ---- gated low-rank update: mask the tiny (Tt, N*R+N) mod, then ONE matmul
    #      against [lora_degen^T ; bias] gives degen + bias[idx]. ----
    lhs = jnp.where(ids_ref[...] == first, mod, 0.0).astype(compute_dtype)
    mod_bias = eta * jnp.dot(lhs, dgb_ref[...],
                             preferred_element_type=jnp.float32)        # (Tt, Dp)

    scale = best if use_gate else jnp.ones_like(best)
    out_ref[...] = ((1.0 - scale) * x + scale * mod_bias).astype(out_ref.dtype)


def make_gloce_forward(dims, *, eta=1.0, use_gate=True,
                       compute_dtype=jnp.bfloat16, tile_t=None):
    """Returns a jitted forward(x_in, params) with all statics baked in."""
    Din, D, Din_p, Dp, N, S, R = dims

    def fwd(x_in, params):
        B, T, _ = x_in.shape
        rows = B * T

        vmem_limit = _vmem_limit_bytes()
        big_vmem = vmem_limit >= 80 * 1024 * 1024       # v5e/v6e vs v7x

        tt = tile_t
        if tt is None:
            tt = min(512 if big_vmem else 256, _round_up(rows, 8))
            # keep >= 4 grid points when possible so both v7x TensorCores work
            while tt > 128 and pl.cdiv(rows, tt) < 4:
                tt = _halve_mult8(tt)

        cdt_size = jnp.dtype(compute_dtype).itemsize
        io_size = jnp.dtype(x_in.dtype).itemsize
        w_bytes = Din_p * Dp * cdt_size
        if 2 * w_bytes > vmem_limit // 2:
            # TODO(synk): K-blocked fallback (f32 accumulator over a Din grid
            # axis) for Linear weights too large to keep VMEM-resident.
            raise NotImplementedError("Linear weight does not fit in VMEM")

        const_bytes = sum(int(a.size) * jnp.dtype(a.dtype).itemsize for a in params)

        def est(t):                                  # rough VMEM budget, bytes
            return (2 * w_bytes                      # W (worst case double-buffered)
                    + 2 * t * Din_p * io_size        # x block x2
                    + 2 * t * Dp * io_size           # out block x2
                    + 4 * t * Dp * 4                 # epilogue f32 temporaries
                    + 2 * const_bytes)               # remaining constants

        while tt > 8 and est(tt) > int(0.8 * vmem_limit):
            tt = _halve_mult8(tt)

        rows_p = _round_up(rows, tt)
        x2 = x_in.reshape(rows, Din)
        pad_r, pad_k = rows_p - rows, Din_p - Din
        if pad_r or pad_k:
            # pad in the native dtype (no f32 round trip); cast happens in-kernel
            x2 = jnp.pad(x2, ((0, pad_r), (0, pad_k)))

        kern = functools.partial(_gloce_kernel, n=N, s=S, eta=float(eta),
                                 use_gate=bool(use_gate),
                                 compute_dtype=compute_dtype)

        # All parameters get whole-array BlockSpecs with a constant index_map,
        # so they are DMA'd exactly once per launch (W included).
        # TODO(synk): single-buffer them with pipeline_mode=pl.Buffered(1) once
        # the installed Pallas version is confirmed to support it.
        in_specs = ([pl.BlockSpec((tt, Din_p), lambda i: (i, 0))]
                    + [pl.BlockSpec(p.shape, lambda i: (0, 0)) for p in params])

        out = pl.pallas_call(
            kern,
            out_shape=jax.ShapeDtypeStruct((rows_p, Dp), x_in.dtype),
            grid=(rows_p // tt,),
            in_specs=in_specs,
            out_specs=pl.BlockSpec((tt, Dp), lambda i: (i, 0)),
            compiler_params=pltpu.CompilerParams(
                dimension_semantics=("parallel",),
                vmem_limit_bytes=vmem_limit),
        )(x2, *params)

        return out[:rows, :D].reshape(B, T, D)

    return jax.jit(fwd)


def gloce_reference(x_in, W, b_lin, mean_diff, vh, center, slope,
                    lora_up, lora_dg, bias_w, debias_w, *, eta=1.0,
                    return_scores=False):
    """Pure-JAX reference mirroring the PyTorch forward exactly."""
    hp = jax.lax.Precision.HIGHEST
    x = jnp.einsum('bti,io->bto', x_in, W, precision=hp) + b_lin[None, None, :]
    xd = x[:, None] - mean_diff[None, :, None, :]                      # (B,N,T,D)
    xdn = xd / jnp.linalg.norm(xd, axis=-1, keepdims=True)
    cont = jnp.einsum('nds,bntd->bnts', vh, xdn, precision=hp) ** 2
    ss = jax.nn.sigmoid(slope[None, :, None]
                        * (cont.sum(-1) - center[None, :, None]))      # (B,N,T)
    idx = jnp.argmax(ss, axis=1)                                       # (B,T)
    scale = jnp.max(ss, axis=1)[..., None]                             # (B,T,1)
    x_db = x - debias_w[idx]
    mod = jnp.einsum('btdh,btd->bth', lora_up[idx], x_db, precision=hp)
    degen = jnp.einsum('btdh,bth->btd', lora_dg[idx], mod, precision=hp)
    mod_bias = eta * (bias_w[idx] + degen)
    out = (1.0 - scale) * x + scale * mod_bias
    return (out, ss) if return_scores else out


def _check(out, ref, scores, *, margin_thresh, atol, name):
    """Compare kernel vs reference only on tokens whose top-2 concept-score
    margin is unambiguous (argmax near-ties are not numerically stable)."""
    top2 = jnp.sort(scores, axis=1)[:, -2:, :]            # (B, 2, T)
    margin = top2[:, 1, :] - top2[:, 0, :]                # (B, T)
    stable = margin > margin_thresh
    err = jnp.max(jnp.abs(out - ref), axis=-1)            # (B, T)
    max_err = float(jnp.max(jnp.where(stable, err, 0.0)))
    frac_stable = float(jnp.mean(stable.astype(jnp.float32)))
    assert frac_stable > 0.3, f"{name}: too few unambiguous tokens ({frac_stable:.2f})"
    assert max_err < atol, f"{name}: max abs err {max_err:.3e} on stable tokens"


if __name__ == "__main__":
    def make_inputs(key, B, T, Din, D, N, S, R):
        ks = jax.random.split(key, 11)
        x_in = jax.random.normal(ks[0], (B, T, Din), jnp.float32)
        W = jax.random.normal(ks[1], (Din, D), jnp.float32) / jnp.sqrt(Din)
        b_lin = 0.1 * jax.random.normal(ks[2], (D,), jnp.float32)
        # Selector params (torch inits these to zero buffers; nonzero here with
        # enough spread that the gate/argmax paths are exercised with healthy
        # score margins).
        mean_diff = 0.1 * jax.random.normal(ks[3], (N, D), jnp.float32)
        vh = 0.3 * jax.random.normal(ks[4], (N, D, S), jnp.float32)
        center = 0.1 + 0.05 * jax.random.normal(ks[5], (N,), jnp.float32)
        slope = 3.0 + jax.random.uniform(ks[6], (N,), jnp.float32)
        # ParamModule-held LoRA params (torch inits to zeros; nonzero here).
        lora_up = 0.05 * jax.random.normal(ks[7], (N, D, R), jnp.float32)
        lora_dg = 0.05 * jax.random.normal(ks[8], (N, D, R), jnp.float32)
        bias_w = 0.05 * jax.random.normal(ks[9], (N, D), jnp.float32)
        debias_w = 0.05 * jax.random.normal(ks[10], (N, D), jnp.float32)
        return (x_in, W, b_lin, mean_diff, vh, center, slope,
                lora_up, lora_dg, bias_w, debias_w)

    key = jax.random.PRNGKey(0)
    k1, k2 = jax.random.split(key)

    # --- small config, f32 MXU operands ---
    args_s = make_inputs(k1, B=2, T=8, Din=32, D=32, N=2, S=2, R=4)
    x_s, rest_s = args_s[0], args_s[1:]
    params_s, dims_s = prepare_gloce_params(*rest_s, compute_dtype=jnp.float32)
    fwd_s = make_gloce_forward(dims_s, compute_dtype=jnp.float32)
    out_s = jax.block_until_ready(fwd_s(x_s, params_s))
    ref_s, ss_s = gloce_reference(*args_s, return_scores=True)
    assert out_s.shape == ref_s.shape
    _check(out_s, ref_s, ss_s, margin_thresh=3e-2, atol=3e-2, name="small-f32")

    # --- same config with bf16 MXU operands (f32 accumulate), loose check ---
    params_h, dims_h = prepare_gloce_params(*rest_s, compute_dtype=jnp.bfloat16)
    fwd_h = make_gloce_forward(dims_h, compute_dtype=jnp.bfloat16)
    out_h = jax.block_until_ready(fwd_h(x_s, params_h))
    assert bool(jnp.all(jnp.isfinite(out_h)))
    _check(out_h, ref_s, ss_s, margin_thresh=5e-2, atol=1.5e-1, name="small-bf16")

    # --- larger config exercising row tiling, VMEM-resident W and D padding ---
    args_b = make_inputs(k2, B=2, T=256, Din=1024, D=256, N=3, S=2, R=4)
    x_b, rest_b = args_b[0], args_b[1:]
    params_b, dims_b = prepare_gloce_params(*rest_b, compute_dtype=jnp.float32)
    fwd_b = make_gloce_forward(dims_b, compute_dtype=jnp.float32)
    out_b = jax.block_until_ready(fwd_b(x_b, params_b))
    ref_b, ss_b = gloce_reference(*args_b, return_scores=True)
    _check(out_b, ref_b, ss_b, margin_thresh=3e-2, atol=3e-2, name="big-f32")

    # TODO(synk): host-side stateful control flow (t_counter / st_step / n_step
    # counters, use_prompt_tuning flag) stays outside the kernel.
    print("KERNEL_OK")
</pallas_src>

<mosaic_0001>
module attributes {stable_mosaic.version = 11 : i64} {
  func.func @_gloce_kernel(%arg0: i32, %arg1: memref<16x128xf32, #tpu.memory_space<vmem>>, %arg2: memref<128x128xf32, #tpu.memory_space<vmem>>, %arg3: memref<1x128xf32, #tpu.memory_space<vmem>>, %arg4: memref<128x16xf32, #tpu.memory_space<vmem>>, %arg5: memref<1x16xf32, #tpu.memory_space<vmem>>, %arg6: memref<1x2xf32, #tpu.memory_space<vmem>>, %arg7: memref<4x2xf32, #tpu.memory_space<vmem>>, %arg8: memref<10x128xf32, #tpu.memory_space<vmem>>, %arg9: memref<1x10xi32, #tpu.memory_space<vmem>>, %arg10: memref<1x2xf32, #tpu.memory_space<vmem>>, %arg11: memref<1x2xf32, #tpu.memory_space<vmem>>, %arg12: memref<16x128xf32, #tpu.memory_space<vmem>>) attributes {dimension_semantics = [#tpu.dimension_semantics<parallel>], iteration_bounds = array<i64: 1>, scalar_prefetch = 0 : i64, scratch_operands = 0 : i64, tpu.core_type = #tpu.core_type<tc>, window_params = [{transform_indices = @transform_0, window_bounds = array<i64: 16, 128>}, {pipeline_mode = #tpu.pipeline_mode<synchronous>, transform_indices = @transform_1, window_bounds = array<i64: 128, 128>}, {pipeline_mode = #tpu.pipeline_mode<synchronous>, transform_indices = @transform_2, window_bounds = array<i64: 1, 128>}, {pipeline_mode = #tpu.pipeline_mode<synchronous>, transform_indices = @transform_3, window_bounds = array<i64: 128, 16>}, {pipeline_mode = #tpu.pipeline_mode<synchronous>, transform_indices = @transform_4, window_bounds = array<i64: 1, 16>}, {pipeline_mode = #tpu.pipeline_mode<synchronous>, transform_indices = @transform_5, window_bounds = array<i64: 1, 2>}, {pipeline_mode = #tpu.pipeline_mode<synchronous>, transform_indices = @transform_6, window_bounds = array<i64: 4, 2>}, {pipeline_mode = #tpu.pipeline_mode<synchronous>, transform_indices = @transform_7, window_bounds = array<i64: 10, 128>}, {pipeline_mode = #tpu.pipeline_mode<synchronous>, transform_indices = @transform_8, window_bounds = array<i64: 1, 10>}, {pipeline_mode = #tpu.pipeline_mode<synchronous>, transform_indices = @transform_9, window_bounds = array<i64: 1, 2>}, {pipeline_mode = #tpu.pipeline_mode<synchronous>, transform_indices = @transform_10, window_bounds = array<i64: 1, 2>}, {transform_indices = @transform_11, window_bounds = array<i64: 16, 128>}]} {
    %c0 = arith.constant 0 : index
    %c0_0 = arith.constant 0 : index
    %0 = vector.load %arg1[%c0, %c0_0] : memref<16x128xf32, #tpu.memory_space<vmem>>, vector<16x128xf32>
    %c0_1 = arith.constant 0 : index
    %c0_2 = arith.constant 0 : index
    %1 = vector.load %arg2[%c0_1, %c0_2] : memref<128x128xf32, #tpu.memory_space<vmem>>, vector<128x128xf32>
    %cst = arith.constant dense<0.000000e+00> : vector<16x128xf32>
    %2 = tpu.matmul %0, %1, %cst {dimension_numbers = #tpu.dot_dimension_numbers<[1], [0], [0], [1], [0, 0, 1, 1], [], []>} : vector<16x128xf32>, vector<128x128xf32>, vector<16x128xf32> -> vector<16x128xf32>
    %c0_3 = arith.constant 0 : index
    %c0_4 = arith.constant 0 : index
    %3 = vector.load %arg3[%c0_3, %c0_4] : memref<1x128xf32, #tpu.memory_space<vmem>>, vector<1x128xf32>
    %4 = vector.broadcast %3 : vector<1x128xf32> to vector<16x128xf32>
    %5 = arith.addf %2, %4 : vector<16x128xf32>
    %c0_5 = arith.constant 0 : index
    %c0_6 = arith.constant 0 : index
    %6 = vector.load %arg4[%c0_5, %c0_6] : memref<128x16xf32, #tpu.memory_space<vmem>>, vector<128x16xf32>
    %cst_7 = arith.constant dense<0.000000e+00> : vector<16x16xf32>
    %7 = tpu.matmul %5, %6, %cst_7 {dimension_numbers = #tpu.dot_dimension_numbers<[1], [0], [0], [1], [0, 0, 1, 1], [], []>} : vector<16x128xf32>, vector<128x16xf32>, vector<16x16xf32> -> vector<16x16xf32>
    %c0_8 = arith.constant 0 : index
    %c0_9 = arith.constant 0 : index
    %8 = vector.load %arg5[%c0_8, %c0_9] : memref<1x16xf32, #tpu.memory_space<vmem>>, vector<1x16xf32>
    %9 = vector.broadcast %8 : vector<1x16xf32> to vector<16x16xf32>
    %10 = arith.subf %7, %9 : vector<16x16xf32>
    %11 = vector.extract_strided_slice %10 {offsets = [0, 0], sizes = [16, 2], strides = [1, 1]} : vector<16x16xf32> to vector<16x2xf32>
    %12 = vector.extract_strided_slice %10 {offsets = [0, 2], sizes = [16, 4], strides = [1, 1]} : vector<16x16xf32> to vector<16x4xf32>
    %13 = vector.extract_strided_slice %10 {offsets = [0, 6], sizes = [16, 10], strides = [1, 1]} : vector<16x16xf32> to vector<16x10xf32>
    %14 = arith.mulf %5, %5 : vector<16x128xf32>
    %cst_10 = arith.constant dense<0.000000e+00> : vector<16xf32>
    %15 = vector.multi_reduction <add>, %14, %cst_10 [1] : vector<16x128xf32> to vector<16xf32>
    %16 = vector.shape_cast %15 : vector<16xf32> to vector<16x1xf32>
    %cst_11 = arith.constant 2.000000e+00 : f32
    %17 = vector.broadcast %cst_11 : f32 to vector<16x2xf32>
    %18 = arith.mulf %17, %11 : vector<16x2xf32>
    %19 = vector.broadcast %16 : vector<16x1xf32> to vector<16x2xf32>
    %20 = arith.subf %19, %18 : vector<16x2xf32>
    %c0_12 = arith.constant 0 : index
    %c0_13 = arith.constant 0 : index
    %21 = vector.load %arg6[%c0_12, %c0_13] : memref<1x2xf32, #tpu.memory_space<vmem>>, vector<1x2xf32>
    %22 = vector.broadcast %21 : vector<1x2xf32> to vector<16x2xf32>
    %23 = arith.addf %20, %22 : vector<16x2xf32>
    %cst_14 = arith.constant 9.99999996E-13 : f32
    %24 = vector.broadcast %cst_14 : f32 to vector<16x2xf32>
    %25 = arith.maximumf %23, %24 : vector<16x2xf32>
    %26 = arith.mulf %12, %12 : vector<16x4xf32>
    %c0_15 = arith.constant 0 : index
    %c0_16 = arith.constant 0 : index
    %27 = vector.load %arg7[%c0_15, %c0_16] : memref<4x2xf32, #tpu.memory_space<vmem>>, vector<4x2xf32>
    %cst_17 = arith.constant dense<0.000000e+00> : vector<16x2xf32>
    %28 = tpu.matmul %26, %27, %cst_17 {dimension_numbers = #tpu.dot_dimension_numbers<[1], [0], [0], [1], [0, 0, 1, 1], [], []>} : vector<16x4xf32>, vector<4x2xf32>, vector<16x2xf32> -> vector<16x2xf32>
    %c0_18 = arith.constant 0 : index
    %c0_19 = arith.constant 0 : index
    %29 = vector.load %arg11[%c0_18, %c0_19] : memref<1x2xf32, #tpu.memory_space<vmem>>, vector<1x2xf32>
    %30 = arith.divf %28, %25 : vector<16x2xf32>
    %c0_20 = arith.constant 0 : index
    %c0_21 = arith.constant 0 : index
    %31 = vector.load %arg10[%c0_20, %c0_21] : memref<1x2xf32, #tpu.memory_space<vmem>>, vector<1x2xf32>
    %32 = vector.broadcast %31 : vector<1x2xf32> to vector<16x2xf32>
    %33 = arith.subf %30, %32 : vector<16x2xf32>
    %34 = vector.broadcast %29 : vector<1x2xf32> to vector<16x2xf32>
    %35 = arith.mulf %34, %33 : vector<16x2xf32>
    %36 = arith.negf %35 : vector<16x2xf32>
    %37 = math.exp %36 : vector<16x2xf32>
    %cst_22 = arith.constant 1.000000e+00 : f32
    %38 = vector.broadcast %cst_22 : f32 to vector<16x2xf32>
    %39 = arith.addf %38, %37 : vector<16x2xf32>
    %40 = arith.divf %38, %39 : vector<16x2xf32>
    %cst_23 = arith.constant dense<0xFF800000> : vector<16xf32>
    %41 = vector.multi_reduction <maximumf>, %40, %cst_23 [1] : vector<16x2xf32> to vector<16xf32>
    %42 = vector.shape_cast %41 : vector<16xf32> to vector<16x1xf32>
    %43 = tpu.iota {dimensions = array<i32: 1>} : vector<16x2xi32>
    %44 = vector.broadcast %42 : vector<16x1xf32> to vector<16x2xf32>
    %45 = arith.cmpf oge, %40, %44 : vector<16x2xf32>
    %c2_i32 = arith.constant 2 : i32
    %46 = vector.broadcast %c2_i32 : i32 to vector<16x2xi32>
    %47 = arith.select %45, %43, %46 : vector<16x2xi1>, vector<16x2xi32>
    %cst_24 = arith.constant dense<2147483647> : vector<16xi32>
    %48 = vector.multi_reduction <minsi>, %47, %cst_24 [1] : vector<16x2xi32> to vector<16xi32>
    %49 = vector.shape_cast %48 : vector<16xi32> to vector<16x1xi32>
    %c0_25 = arith.constant 0 : index
    %c0_26 = arith.constant 0 : index
    %50 = vector.load %arg9[%c0_25, %c0_26] : memref<1x10xi32, #tpu.memory_space<vmem>>, vector<1x10xi32>
    %51 = vector.broadcast %50 : vector<1x10xi32> to vector<16x10xi32>
    %52 = vector.broadcast %49 : vector<16x1xi32> to vector<16x10xi32>
    %53 = arith.cmpi eq, %51, %52 : vector<16x10xi32>
    %cst_27 = arith.constant 0.000000e+00 : f32
    %54 = vector.broadcast %cst_27 : f32 to vector<16x10xf32>
    %55 = arith.select %53, %13, %54 : vector<16x10xi1>, vector<16x10xf32>
    %c0_28 = arith.constant 0 : index
    %c0_29 = arith.constant 0 : index
    %56 = vector.load %arg8[%c0_28, %c0_29] : memref<10x128xf32, #tpu.memory_space<vmem>>, vector<10x128xf32>
    %cst_30 = arith.constant dense<0.000000e+00> : vector<16x128xf32>
    %57 = tpu.matmul %55, %56, %cst_30 {dimension_numbers = #tpu.dot_dimension_numbers<[1], [0], [0], [1], [0, 0, 1, 1], [], []>} : vector<16x10xf32>, vector<10x128xf32>, vector<16x128xf32> -> vector<16x128xf32>
    %cst_31 = arith.constant 1.000000e+00 : f32
    %58 = vector.broadcast %cst_31 : f32 to vector<16x128xf32>
    %59 = arith.mulf %58, %57 : vector<16x128xf32>
    %cst_32 = arith.constant 1.000000e+00 : f32
    %60 = vector.broadcast %cst_32 : f32 to vector<16x1xf32>
    %61 = arith.subf %60, %42 : vector<16x1xf32>
    %62 = vector.broadcast %61 : vector<16x1xf32> to vector<16x128xf32>
    %63 = arith.mulf %62, %5 : vector<16x128xf32>
    %64 = vector.broadcast %42 : vector<16x1xf32> to vector<16x128xf32>
    %65 = arith.mulf %64, %59 : vector<16x128xf32>
    %66 = arith.addf %63, %65 : vector<16x128xf32>
    %c0_33 = arith.constant 0 : index
    %c0_34 = arith.constant 0 : index
    %67 = vector.load %arg12[%c0_33, %c0_34] : memref<16x128xf32, #tpu.memory_space<vmem>>, vector<16x128xf32>
    tpu.vector_store %arg12[%c0_33, %c0_34], %66 {strides = array<i32>} : memref<16x128xf32, #tpu.memory_space<vmem>>, vector<16x128xf32>,
    return
  }
  func.func @transform_0(%arg0: i32) -> (i32, i32) {
    %c0_i32 = arith.constant 0 : i32
    %c0_i32_0 = arith.constant 0 : i32
    return %arg0, %c0_i32 : i32, i32
  }
  func.func @transform_1(%arg0: i32) -> (i32, i32) {
    %c0_i32 = arith.constant 0 : i32
    %c0_i32_0 = arith.constant 0 : i32
    %c0_i32_1 = arith.constant 0 : i32
    return %c0_i32, %c0_i32_0 : i32, i32
  }
  func.func @transform_2(%arg0: i32) -> (i32, i32) {
    %c0_i32 = arith.constant 0 : i32
    %c0_i32_0 = arith.constant 0 : i32
    %c0_i32_1 = arith.constant 0 : i32
    return %c0_i32, %c0_i32_0 : i32, i32
  }
  func.func @transform_3(%arg0: i32) -> (i32, i32) {
    %c0_i32 = arith.constant 0 : i32
    %c0_i32_0 = arith.constant 0 : i32
    %c0_i32_1 = arith.constant 0 : i32
    return %c0_i32, %c0_i32_0 : i32, i32
  }
  func.func @transform_4(%arg0: i32) -> (i32, i32) {
    %c0_i32 = arith.constant 0 : i32
    %c0_i32_0 = arith.constant 0 : i32
    %c0_i32_1 = arith.constant 0 : i32
    return %c0_i32, %c0_i32_0 : i32, i32
  }
  func.func @transform_5(%arg0: i32) -> (i32, i32) {
    %c0_i32 = arith.constant 0 : i32
    %c0_i32_0 = arith.constant 0 : i32
    %c0_i32_1 = arith.constant 0 : i32
    return %c0_i32, %c0_i32_0 : i32, i32
  }
  func.func @transform_6(%arg0: i32) -> (i32, i32) {
    %c0_i32 = arith.constant 0 : i32
    %c0_i32_0 = arith.constant 0 : i32
    %c0_i32_1 = arith.constant 0 : i32
    return %c0_i32, %c0_i32_0 : i32, i32
  }
  func.func @transform_7(%arg0: i32) -> (i32, i32) {
    %c0_i32 = arith.constant 0 : i32
    %c0_i32_0 = arith.constant 0 : i32
    %c0_i32_1 = arith.constant 0 : i32
    return %c0_i32, %c0_i32_0 : i32, i32
  }
  func.func @transform_8(%arg0: i32) -> (i32, i32) {
    %c0_i32 = arith.constant 0 : i32
    %c0_i32_0 = arith.constant 0 : i32
    %c0_i32_1 = arith.constant 0 : i32
    return %c0_i32, %c0_i32_0 : i32, i32
  }
  func.func @transform_9(%arg0: i32) -> (i32, i32) {
    %c0_i32 = arith.constant 0 : i32
    %c0_i32_0 = arith.constant 0 : i32
    %c0_i32_1 = arith.constant 0 : i32
    return %c0_i32, %c0_i32_0 : i32, i32
  }
  func.func @transform_10(%arg0: i32) -> (i32, i32) {
    %c0_i32 = arith.constant 0 : i32
    %c0_i32_0 = arith.constant 0 : i32
    %c0_i32_1 = arith.constant 0 : i32
    return %c0_i32, %c0_i32_0 : i32, i32
  }
  func.func @transform_11(%arg0: i32) -> (i32, i32) {
    %c0_i32 = arith.constant 0 : i32
    %c0_i32_0 = arith.constant 0 : i32
    return %arg0, %c0_i32 : i32, i32
  }
}

</mosaic_0001>

<bundles_post_ra>
// kernel: fwd.1
= control target key start
LH: loop header
LB: loop body
LE: loop exit
PB: predicated region body
PF: predicated region fallthrough
CT: control target
= control target key end

     0   :  { %vm273_vm0 = vcmask 1043456   ;;  %s701_s30 = smov 126   ;;  %vm268_vm1 = vcmask 31744   ;;  %vm386_vm2 = vcmask 15360   ;;  %vm455_vm7 = vcmask 1041408   ;;  %s927_s1 = inlined_call_operand.vmem [shape: f32[128,128], index: 1, kind: input, shape index: {}]   ;;  %s928_s0 = inlined_call_operand.vmem [shape: f32[16,128], index: 0, kind: input, shape index: {}]   ;;  %s929_s3 = inlined_call_operand.vmem [shape: f32[128,16], index: 3, kind: input, shape index: {}]   ;;  %s930_s2 = inlined_call_operand.vmem [shape: f32[1,128], index: 2, kind: input, shape index: {}]   ;;  %s931_s6 = inlined_call_operand.vmem [shape: f32[4,2], index: 6, kind: input, shape index: {}]   ;;  %s932_s4 = inlined_call_operand.vmem [shape: f32[1,16], index: 4, kind: input, shape index: {}]   ;;  %s933_s5 = inlined_call_operand.vmem [shape: f32[1,2], index: 5, kind: input, shape index: {}]   ;;  %s934_s9 = inlined_call_operand.vmem [shape: f32[1,2], index: 9, kind: input, shape index: {}]   ;;  %s935_s10 = inlined_call_operand.vmem [shape: f32[1,2], index: 10, kind: input, shape index: {}]   ;;  %s936_s7 = inlined_call_operand.vmem [shape: f32[10,128], index: 7, kind: input, shape index: {}]   ;;  %s937_s8 = inlined_call_operand.vmem [shape: s32[1,10], index: 8, kind: input, shape index: {}]   ;;  %s938_s11 = inlined_call_operand.vmem [shape: f32[16,128], index: 11, kind: output, shape index: {}]  }
   0x1   :  { %v55_v0 = vld [vmem:[%s927_s1 + $0x78] sm:$0xff]  ;;  %v54_v1 = vld [vmem:[%s927_s1 + $0x70] sm:$0xff]  ;;  %v53_v2 = vld [vmem:[%s927_s1 + $0x68] sm:$0xff]  ;;  %vm448_vm9 = vcmask 80896  }
   0x2   :  { %605 = vmatprep.subr.mxu0 %v55_v0  ;;  %v52_v3 = vld [vmem:[%s927_s1 + $0x60] sm:$0xff]  ;;  %v51_v5 = vld [vmem:[%s927_s1 + $0x58] sm:$0xff]  ;;  %v152_v7 = vld [vmem:[%s929_s3 + $0x70] sm:$0xff] }
   0x3   :  { %606 = vmatpush3.msra.mxu0 %v55_v0  ;;  %v38_v4 = vld [vmem:[%s928_s0] sm:$0xff]  ;;  %v153_v6 = vld [vmem:[%s929_s3 + $0x78] sm:$0xff]  ;;  %v50_v8 = vld [vmem:[%s927_s1 + $0x50] sm:$0xff] }
   0x4   :  { %607 = vmatprep.subr.mxu0 %v54_v1  ;;  %637 = vmatprep.mubr.f32.mxu0 %v38_v4  ;;  %v151_v9 = vld [vmem:[%s929_s3 + $0x68] sm:$0xff]  ;;  %v150_v11 = vld [vmem:[%s929_s3 + $0x60] sm:$0xff]  ;;  %v149_v13 = vld [vmem:[%s929_s3 + $0x58] sm:$0xff] }
   0x5   :  { %608 = vmatpush3.msra.mxu0 %v54_v1  ;;  %640 = vmatprep.subr.mxu1 %v153_v6  ;;  %v49_v10 = vld [vmem:[%s927_s1 + $0x48] sm:$0xff]  ;;  %v48_v12 = vld [vmem:[%s927_s1 + $0x40] sm:$0xff]  ;;  %v47_v14 = vld [vmem:[%s927_s1 + $0x38] sm:$0xff] }
   0x6   :  { %609 = vmatprep.subr.mxu0 %v53_v2  ;;  %641 = vmatpush3.msra.mxu1 %v153_v6  ;;  %v148_v15 = vld [vmem:[%s929_s3 + $0x50] sm:$0xff]  ;;  %v147_v17 = vld [vmem:[%s929_s3 + $0x48] sm:$0xff]  ;;  %v146_v19 = vld [vmem:[%s929_s3 + $0x40] sm:$0xff] }
   0x7   :  { %610 = vmatpush3.msra.mxu0 %v53_v2  ;;  %642 = vmatprep.subr.mxu1 %v152_v7  ;;  %v46_v16 = vld [vmem:[%s927_s1 + $0x30] sm:$0xff]  ;;  %v45_v18 = vld [vmem:[%s927_s1 + $0x28] sm:$0xff]  ;;  %v44_v20 = vld [vmem:[%s927_s1 + $0x20] sm:$0xff] }
   0x8   :  { %611 = vmatprep.subr.mxu0 %v52_v3  ;;  %643 = vmatpush3.msra.mxu1 %v152_v7  ;;  %v145_v21 = vld [vmem:[%s929_s3 + $0x38] sm:$0xff]  ;;  %v144_v23 = vld [vmem:[%s929_s3 + $0x30] sm:$0xff]  ;;  %v143_v25 = vld [vmem:[%s929_s3 + $0x28] sm:$0xff] }
   0x9   :  { %612 = vmatpush3.msra.mxu0 %v52_v3  ;;  %644 = vmatprep.subr.mxu1 %v151_v9  ;;  %v43_v22 = vld [vmem:[%s927_s1 + $0x18] sm:$0xff]  ;;  %v42_v24 = vld [vmem:[%s927_s1 + $0x10] sm:$0xff]  ;;  %v41_v26 = vld [vmem:[%s927_s1 + $0x8] sm:$0xff] }
   0xa   :  { %613 = vmatprep.subr.mxu0 %v51_v5  ;;  %645 = vmatpush3.msra.mxu1 %v151_v9  ;;  %v142_v27 = vld [vmem:[%s929_s3 + $0x20] sm:$0xff]  ;;  %v141_v29 = vld [vmem:[%s929_s3 + $0x18] sm:$0xff]  ;;  %v39_v30 = vld [vmem:[%s928_s0 + $0x8] sm:$0xff] }
   0xb   :  { %614 = vmatpush3.msra.mxu0 %v51_v5  ;;  %646 = vmatprep.subr.mxu1 %v150_v11  ;;  %v40_v28 = vld [vmem:[%s927_s1] sm:$0xff]  ;;  %v140_v31 = vld [vmem:[%s929_s3 + $0x10] sm:$0xff]  ;;  %v139_v32 = vld [vmem:[%s929_s3 + $0x8] sm:$0xff] }
   0xc   :  { %615 = vmatprep.subr.mxu0 %v50_v8  ;;  %647 = vmatpush3.msra.mxu1 %v150_v11  ;;  %v138_v33 = vld [vmem:[%s929_s3] sm:$0xff] }
   0xd   :  { %616 = vmatpush3.msra.mxu0 %v50_v8  ;;  %648 = vmatprep.subr.mxu1 %v149_v13  ;;  %v548_v35 = vld [vmem:[%s930_s2] ss:$0 sm:$0xff] }
   0xe   :  { %617 = vmatprep.subr.mxu0 %v49_v10  ;;  %649 = vmatpush3.msra.mxu1 %v149_v13  ;;  %v261_v41 = vld [vmem:[%s931_s6] sm:$0xf] }
   0xf   :  { %618 = vmatpush3.msra.mxu0 %v49_v10  ;;  %650 = vmatprep.subr.mxu1 %v148_v15  ;;  %v549_v43 = vld [vmem:[%s932_s4] ss:$0 sm:$0xff] }
  0x10   :  { %619 = vmatprep.subr.mxu0 %v48_v12  ;;  %651 = vmatpush3.msra.mxu1 %v148_v15  ;;  %v550_v56 = vld [vmem:[%s933_s5] ss:$0 sm:$0xff]  ;;  %s702_s5 = smov 122  }
  0x11   :  { %620 = vmatpush3.msra.mxu0 %v48_v12  ;;  %652 = vmatprep.subr.mxu1 %v147_v17  ;;  %v554_v0 = vld [vmem:[%s934_s9] ss:$0 sm:$0xff] }
  0x12   :  { %621 = vmatprep.subr.mxu0 %v47_v14  ;;  %653 = vmatpush3.msra.mxu1 %v147_v17  ;;  %v555_v3 = vld [vmem:[%s935_s10] ss:$0 sm:$0xff] }
  0x13   :  { %622 = vmatpush3.msra.mxu0 %v47_v14  ;;  %654 = vmatprep.subr.mxu1 %v146_v19 }
  0x14   :  { %623 = vmatprep.subr.mxu0 %v46_v16  ;;  %655 = vmatpush3.msra.mxu1 %v146_v19 }
  0x15   :  { %624 = vmatpush3.msra.mxu0 %v46_v16  ;;  %656 = vmatprep.subr.mxu1 %v145_v21 }
  0x16   :  { %625 = vmatprep.subr.mxu0 %v45_v18  ;;  %657 = vmatpush3.msra.mxu1 %v145_v21 }
  0x17   :  { %626 = vmatpush3.msra.mxu0 %v45_v18  ;;  %658 = vmatprep.subr.mxu1 %v144_v23 }
  0x18   :  { %627 = vmatprep.subr.mxu0 %v44_v20  ;;  %659 = vmatpush3.msra.mxu1 %v144_v23 }
  0x19   :  { %628 = vmatpush3.msra.mxu0 %v44_v20  ;;  %660 = vmatprep.subr.mxu1 %v143_v25  ;;  %v393_v20 = vlaneseq }
  0x1a   :  { %629 = vmatprep.subr.mxu0 %v43_v22  ;;  %661 = vmatpush3.msra.mxu1 %v143_v25 }
  0x1b   :  { %630 = vmatpush3.msra.mxu0 %v43_v22  ;;  %662 = vmatprep.subr.mxu1 %v142_v27  ;;  %v394_v21 = vand.u32 127, %v393_v20 }
  0x1c   :  { %631 = vmatprep.subr.mxu0 %v42_v24  ;;  %663 = vmatpush3.msra.mxu1 %v142_v27 }
  0x1d   :  { %632 = vmatpush3.msra.mxu0 %v42_v24  ;;  %664 = vmatprep.subr.mxu1 %v141_v29 }
  0x1e   :  { %633 = vmatprep.subr.mxu0 %v41_v26  ;;  %665 = vmatpush3.msra.mxu1 %v141_v29 }
  0x1f   :  { %634 = vmatpush3.msra.mxu0 %v41_v26  ;;  %666 = vmatprep.subr.mxu1 %v140_v31 }
  0x20   :  { %635 = vmatprep.subr.mxu0 %v40_v28  ;;  %667 = vmatpush3.msra.mxu1 %v140_v31 }
  0x21   :  { %636 = vmatpush3.msra.mxu0 %v40_v28  ;;  %668 = vmatprep.subr.mxu1 %v139_v32 }
  0x22   :  { %638 = vmatmul.mubr.f32.vlgmr.msra.gmra.mxu0 %v39_v30  ;;  %669 = vmatpush3.msra.mxu1 %v139_v32 }
  0x23   :  { %670 = vmatprep.subr.mxu1 %v138_v33  ;;  %675 = vmatprep.subr.msk.mxu0 %vm273_vm0, %v261_v41 }
  0x24   :  { %671 = vmatpush3.msra.mxu1 %v138_v33  ;;  %676 = vmatpush3.msk.msra.mxu0 %vm273_vm0, %v261_v41 }
  0xe2   :  { %v639_v34 = vpop.f32.mrf.mxu0 }
  0xe3   :  { %v870_v38 = vadd.f32 %v639_v34, %v548_v35 }
  0xe4   :  { %v129_v36 = vpop.f32.mrf.mxu0 }
  0xe5   :  { %v868_v37 = vadd.f32 %v548_v35, %v129_v36  ;;  %v239_v40 = vmul.f32 %v870_v38, %v870_v38 }
  0xe7   :  { %672 = vmatprep.mubr.f32.mxu1 %v868_v37  ;;  %v238_v39 = vmul.f32 %v868_v37, %v868_v37 }
  0xe8   :  { %673 = vmatmul.mubr.f32.vlgmr.msra.gmra.mxu1 %v870_v38 }
  0xe9   :  { %240 = vadd.xlane.f32.xlu1 %v238_v39 }
  0xed   :  { %242 = vadd.xlane.f32.xlu1 %v239_v40 }
 0x172   :  { %v241_v51 = vpop.xlane.xlu1 %240 }
 0x176   :  { %v243_v54 = vpop.xlane.xlu1 %242 }
 0x1a8   :  { %v674_v42 = vpop.f32.mrf.mxu1 }
 0x1a9   :  { %v237_v46 = vsub.f32 %v674_v42, %v549_v43  ;;  %v447_v42 = vld [vmem:[%s936_s7 + $0x8] sm:$0x3] }
 0x1aa   :  { %v220_v44 = vpop.f32.mrf.mxu1  ;;  %680 = vmatprep.subr.msk.mxu1 %vm455_vm7, %v447_v42 }
 0x1ab   :  { %v884_v45 = vsub.f32 %v220_v44, %v549_v43  ;;  %v260_v48 = vmul.f32 %v237_v46, %v237_v46  ;;  %v245_v52 = vmul.f32 2.0, %v237_v46  ;;  %681 = vmatpush3.msk.msra.mxu1 %vm455_vm7, %v447_v42  ;;  %v446_v43 = vld [vmem:[%s936_s7] sm:$0xff] }
 0x1ac   :  { %682 = vmatprep.subr.mxu1 %v446_v43 }
 0x1ad   :  { %v259_v47 = vmul.f32 %v884_v45, %v884_v45  ;;  %v244_v53 = vmul.f32 2.0, %v884_v45  ;;  %v247_v55 = vsub.f32 %v243_v54, %v245_v52  ;;  %683 = vmatpush3.msra.mxu1 %v446_v43  ;;  %v558_v54 = vld [vmem:[%s937_s8] ss:$0 sm:$0xff] }
 0x1af   :  { %264 = vrot.lane.b32.xlu0 %v259_v47, %s701_s30  ;;  %v246_v57 = vsub.f32 %v241_v51, %v244_v53  ;;  %v256_v58 = vadd.f32 %v550_v56, %v247_v55 }
 0x1b1   :  { %v255_v59 = vadd.f32 %v550_v56, %v246_v57  ;;  %v258_v60 = vmax.f32 %v256_v58, 1e-12 }
 0x1b3   :  { %266 = vrot.lane.b32.xlu0 %v260_v48, %s701_s30  ;;  %v257_v61 = vmax.f32 %v255_v59, 1e-12  ;;  %689 = vrcp.f32 %v258_v60 }
 0x1b5   :  { %691 = vrcp.f32 %v257_v61 }
 0x1c0   :  { %v690_v62 = vpop.eup %689 }
 0x1c2   :  { %v692_v2 = vpop.eup %691 }
 0x221   :  { %v265_v49 = vpop.permute.xlu0 %264 }
 0x222   :  { %677 = vmatprep.mubr.msk.f32.mxu0 %vm268_vm1, %v265_v49 }
 0x225   :  { %v267_v50 = vpop.permute.xlu0 %266 }
 0x226   :  { %678 = vmatmul.mubr.msk.f32.vlgmr.msra.gmra.mxu0 %vm268_vm1, %v267_v50 }
 0x2e6   :  { %v679_v63 = vpop.f32.mrf.mxu0 }
 0x2e7   :  { %v356_v1 = vmul.f32 %v690_v62, %v679_v63 }
 0x2e8   :  { %v343_v4 = vpop.f32.mrf.mxu0 }
 0x2e9   :  { %v365_v5 = vsub.f32 %v356_v1, %v554_v0  ;;  %v354_v6 = vmul.f32 %v692_v2, %v343_v4 }
 0x2eb   :  { %v373_v7 = vmul.f32 %v555_v3, %v365_v5  ;;  %v364_v8 = vsub.f32 %v354_v6, %v554_v0 }
 0x2ed   :  { %v557_v9 = vmul.f32 -1.442695, %v373_v7  ;;  %v372_v10 = vmul.f32 %v555_v3, %v364_v8 }
 0x2ef   :  { %693 = vpow2.f32 %v557_v9  ;;  %v556_v11 = vmul.f32 -1.442695, %v372_v10 }
 0x2f1   :  { %695 = vpow2.f32 %v556_v11 }
 0x2fc   :  { %v694_v12 = vpop.eup %693 }
 0x2fd   :  { %v381_v13 = vadd.f32 1.0, %v694_v12 }
 0x2fe   :  { %v696_v14 = vpop.eup %695 }
 0x2ff   :  { %697 = vrcp.f32 %v381_v13  ;;  %v380_v15 = vadd.f32 1.0, %v696_v14 }
 0x301   :  { %699 = vrcp.f32 %v380_v15 }
 0x30c   :  { %v698_v16 = vpop.eup %697 }
 0x30d   :  { %v390_v17 = vsel %vm386_vm2, %v698_v16, -inf }
 0x30e   :  { %v700_v18 = vpop.eup %699  ;;  %391 = vmax.xlane.f32.xlu1 %v390_v17 }
 0x30f   :  { %v387_v19 = vsel %vm386_vm2, %v700_v18, -inf }
 0x310   :  { %388 = vmax.xlane.f32.xlu0 %v387_v19 }
 0x326   :  { %440 = vrot.lane.b32.xlu0 %v237_v46, %s702_s5 }
 0x397   :  { %v392_v22 = vpop.xlane.xlu1 %391 }
 0x398   :  { %vm396_vm3 = vcmp.ge.f32.partialorder %v698_v16, %v392_v22  ;;  %v535_v59 = vsub.f32 1.0, %v392_v22 }
 0x399   :  { %v901_v23 = vpop.xlane.xlu0 %388  ;;  %v398_v24 = vsel %vm396_vm3, %v394_v21, 2 }
 0x39a   :  { %vm395_vm4 = vcmp.ge.f32.partialorder %v700_v18, %v901_v23  ;;  %v414_v27 = vsel %vm386_vm2, %v398_v24, 2147483647  ;;  %v534_v60 = vsub.f32 1.0, %v901_v23  ;;  %v537_v62 = vmul.f32 %v535_v59, %v870_v38 }
 0x39b   :  { %v397_v25 = vsel %vm395_vm4, %v394_v21, 2  ;;  %v416_v30 = vshra.s32 %v414_v27, 16  ;;  %v415_v33 = vand.u32 65535, %v414_v27 }
 0x39c   :  { %v399_v26 = vsel %vm386_vm2, %v397_v25, 2147483647  ;;  %v536_v2 = vmul.f32 %v534_v60, %v868_v37 }
 0x39d   :  { %v401_v28 = vshra.s32 %v399_v26, 16  ;;  %v418_v31 = vcvt.s32.f32 %v416_v30  ;;  %v417_v35 = vcvt.s32.f32 %v415_v33  ;;  %v400_v36 = vand.u32 65535, %v399_v26  ;;  %v441_v57 = vpop.permute.xlu0 %440 }
 0x39f   :  { %v403_v29 = vcvt.s32.f32 %v401_v28  ;;  %v402_v40 = vcvt.s32.f32 %v400_v36 }
 0x3a1   :  { %404 = vmin.xlane.f32.xlu1 %v403_v29 }
 0x3a5   :  { %419 = vmin.xlane.f32.xlu1 %v418_v31 }
 0x42a   :  { %v405_v32 = vpop.xlane.xlu1 %404 }
 0x42b   :  { %vm406_vm6 = vcmp.eq.f32.partialorder %v403_v29, %v405_v32  ;;  %v411_v47 = vcvt.f32.s32 %v405_v32 }
 0x42c   :  { %v407_v41 = vsel %vm406_vm6, %v402_v40, inf }
 0x42d   :  { %v412_v52 = vshll.u32 %v411_v47, 16 }
 0x42e   :  { %v420_v34 = vpop.xlane.xlu1 %419 }
 0x42f   :  { %vm421_vm5 = vcmp.eq.f32.partialorder %v418_v31, %v420_v34  ;;  %v426_v44 = vcvt.f32.s32 %v420_v34 }
 0x430   :  { %v422_v39 = vsel %vm421_vm5, %v417_v35, inf }
 0x431   :  { %423 = vmin.xlane.f32.xlu1 %v422_v39  ;;  %v427_v49 = vshll.u32 %v426_v44, 16 }
 0x435   :  { %408 = vmin.xlane.f32.xlu1 %v407_v41 }
 0x446   :  { %438 = vrot.lane.b32.xlu1 %v884_v45, %s702_s5 }
 0x4ba   :  { %v424_v46 = vpop.xlane.xlu1 %423 }
 0x4bb   :  { %v425_v48 = vcvt.f32.s32 %v424_v46 }
 0x4bd   :  { %v428_v50 = vadd.s32 %v427_v49, %v425_v48 }
 0x4be   :  { %v409_v51 = vpop.xlane.xlu1 %408 }
 0x4bf   :  { %v410_v53 = vcvt.f32.s32 %v409_v51  ;;  %vm435_vm8 = vcmp.eq.s32.totalorder %v558_v54, %v428_v50 }
 0x4c0   :  { %v445_v58 = vsel %vm435_vm8, %v441_v57, 0.0 }
 0x4c1   :  { %v413_v55 = vadd.s32 %v412_v52, %v410_v53 }
 0x4c2   :  { %v439_v56 = vpop.permute.xlu1 %438 }
 0x4c3   :  { %vm434_vm10 = vcmp.eq.s32.totalorder %v558_v54, %v413_v55 }
 0x4c4   :  { %v444_v45 = vsel %vm434_vm10, %v439_v56, 0.0 }
 0x4c5   :  { %684 = vmatprep.mubr.msk.f32.mxu1 %vm448_vm9, %v444_v45 }
 0x4c6   :  { %685 = vmatmul.mubr.msk.f32.vlgmr.msra.gmra.mxu1 %vm448_vm9, %v445_v58 }
 0x586   :  { %v686_v61 = vpop.f32.mrf.mxu1 }
 0x587   :  { %v539_v63 = vmul.f32 %v686_v61, %v392_v22 }
 0x588   :  { %v525_v0 = vpop.f32.mrf.mxu1 }
 0x589   :  { %v541_v1 = vadd.f32 %v539_v63, %v537_v62  ;;  %v538_v3 = vmul.f32 %v525_v0, %v901_v23 }
 0x58b   :  { %543 = vst [vmem:[%s938_s11 + $0x8] sm:$0xff] %v541_v1  ;;  %v540_v4 = vadd.f32 %v538_v3, %v536_v2 }
 0x58d   :  { %542 = vst [vmem:[%s938_s11] sm:$0xff] %v540_v4 }

</bundles_post_ra>
